<compile_context>
chip_gen: v5e
topology: v5e:2x2
jax: 0.10.0
libtpu: 0.0.40
codegen_flags: <defaults>
</compile_context>

<pallas_src>
import math
import functools

import jax
import jax.numpy as jnp
from jax.experimental import pallas as pl
from jax.experimental.pallas import tpu as pltpu

LOG2PI = math.log(2.0 * math.pi)

# ---------------- problem sizes (toy, consistent with B x T x D sequences) ---
B, T = 2, 8
DY, DU, DX, DB = 16, 4, 8, 4      # obs, input, latent, behaviour dims
H_ENC, H_PRIOR = 32, 16           # hidden widths
BT = B * T

DYU = DY + DU                     # encoder input width  (cat(y,u))
DXU = DX + DU                     # prior   input width  (cat(x,u))
DMU = 2 * DX                      # fused (mu | logvar) head width
DOB = DY + DB                     # fused (decoder | behaviour) head width
DATA_COLS = DY + DU + DB + DX     # packed data columns: [y | u | y_behav | eps]

# ---------------- packed parameter-sheet layout (P_ROWS x 32 cols, f32) ------
P_COLS = max(H_ENC, DMU, H_PRIOR, DOB, DX)           # 32
R_WE1 = 0                         # (DYU, H_ENC)   [We1_y ; We1_u]
R_BE1 = R_WE1 + DYU               # (1,  H_ENC)
R_WH = R_BE1 + 1                  # (H_ENC, DMU)   [Wmu | Wlv]
R_BH = R_WH + H_ENC               # (1,  DMU)
R_WP1 = R_BH + 1                  # (DXU, H_PRIOR) [Wp1_x ; Wp1_u]
R_BP1 = R_WP1 + DXU               # (1,  H_PRIOR)
R_WP2 = R_BP1 + 1                 # (H_PRIOR, DX)
R_BP2 = R_WP2 + H_PRIOR           # (1,  DX)
R_LVP = R_BP2 + 1                 # (1,  DX)
R_WDB = R_LVP + 1                 # (DX, DOB)      [Wd | Wb]
R_BDB = R_WDB + DX                # (1,  DOB)
R_LVDB = R_BDB + 1                # (1,  DOB)
P_ROWS = ((R_LVDB + 1 + 7) // 8) * 8                 # 96 (sublane aligned)

# original (unfused) parameter names, as the reference module would hold them
PARAM_ORDER = [
    "We1_y", "We1_u", "be1", "Wmu", "bmu", "Wlv", "blv",
    "Wp1_x", "Wp1_u", "bp1", "Wp2", "bp2", "lvp",
    "Wd", "bd", "lvd",
    "Wb", "bb", "lvb",
]


def _gauss_logpdf(x, mean, logvar):
    # Normal(mean, sqrt(exp(logvar))).log_prob(x), elementwise
    return -0.5 * (LOG2PI + logvar + (x - mean) ** 2 * jnp.exp(-logvar))


def cond_seq_vae_kernel(data_ref, p_ref, out_ref):
    """Fused encoder / prior / decoder / behaviour readout + log-prob sums."""
    dot = functools.partial(jnp.dot, preferred_element_type=jnp.float32)

    # views into the packed data tile: columns are [y | u | y_behav | eps]
    yu = data_ref[:, 0:DYU]                       # (BT, DY+DU) encoder input
    y = data_ref[:, 0:DY]
    u = data_ref[:, DY:DYU]
    yb = data_ref[:, DYU:DYU + DB]
    # TODO(synk): at scale, generate eps in-kernel with pltpu.prng_seed /
    # pltpu.prng_random_bits; kept as an input here for exact reference parity.
    eps = data_ref[:, DYU + DB:DATA_COLS]

    # ---- encoder q(x|y,u): fused cat(y,u) matmul + fused (mu|logvar) head ---
    h = jnp.tanh(dot(yu, p_ref[R_WE1:R_BE1, :H_ENC]) + p_ref[R_BE1:R_WH, :H_ENC])
    ml = dot(h, p_ref[R_WH:R_BH, :DMU]) + p_ref[R_BH:R_WP1, :DMU]
    mu, logvar = ml[:, :DX], ml[:, DX:DMU]
    x = mu + jnp.exp(0.5 * logvar) * eps          # reparameterized sample
    log_q = jnp.sum(_gauss_logpdf(x, mu, logvar), axis=(0, 1), keepdims=True)

    # ---- conditional prior p(x_{t+1}|x_t,u_t), computed on all BT rows ------
    # cat(x,u) @ [Wp1_x; Wp1_u] expanded as two dots on the stacked weight
    # (avoids an in-kernel lane concat of the freshly computed x).
    hp = jnp.tanh(dot(x, p_ref[R_WP1:R_WP1 + DX, :H_PRIOR])
                  + dot(u, p_ref[R_WP1 + DX:R_BP1, :H_PRIOR])
                  + p_ref[R_BP1:R_WP2, :H_PRIOR])
    mu_p = dot(hp, p_ref[R_WP2:R_BP2, :DX]) + p_ref[R_BP2:R_LVP, :DX]
    lv_p = p_ref[R_LVP:R_WDB, :DX]
    # x_next[r] = x[r+1], built with a superdiagonal shift matmul so every
    # operand stays a full (BT, DX) tile (no unaligned x[1:]/x[:-1] slices).
    row = jax.lax.broadcasted_iota(jnp.int32, (BT, BT), 0)
    col = jax.lax.broadcasted_iota(jnp.int32, (BT, BT), 1)
    shift = jnp.where(col == row + 1, 1.0, 0.0)
    x_next = dot(shift, x)                        # (BT, DX); last row = 0
    # mask out the last timestep of every sequence (cross-sequence pairs)
    t_idx = jax.lax.broadcasted_iota(jnp.int32, (BT, DX), 0) % T
    lp_p = jnp.where(t_idx != T - 1, _gauss_logpdf(x_next, mu_p, lv_p), 0.0)
    log_prior = jnp.sum(lp_p, axis=(0, 1), keepdims=True)

    # ---- decoder p(y|x) + behaviour readout p(y_behav|x): one MXU pass ------
    yhat = dot(x, p_ref[R_WDB:R_BDB, :DOB]) + p_ref[R_BDB:R_LVDB, :DOB]
    lv_db = p_ref[R_LVDB:R_LVDB + 1, :DOB]
    log_like = jnp.sum(_gauss_logpdf(y, yhat[:, :DY], lv_db[:, :DY]),
                       axis=(0, 1), keepdims=True)
    log_like_b = jnp.sum(_gauss_logpdf(yb, yhat[:, DY:DOB], lv_db[:, DY:DOB]),
                         axis=(0, 1), keepdims=True)

    # ---- single packed output: [Σlog_q, Σlog_prior, Σlog_like, Σlog_like_bv]
    lane = jax.lax.broadcasted_iota(jnp.int32, (1, 4), 1)
    out_ref[...] = (jnp.where(lane == 0, log_q, 0.0)
                    + jnp.where(lane == 1, log_prior, 0.0)
                    + jnp.where(lane == 2, log_like, 0.0)
                    + jnp.where(lane == 3, log_like_b, 0.0))


def pack_params(p):
    """Fuse + pack all parameters into one (P_ROWS, P_COLS) f32 sheet (1 DMA)."""
    sheet = jnp.zeros((P_ROWS, P_COLS), jnp.float32)

    def put(s, r, a):
        a = jnp.asarray(a, jnp.float32)
        return s.at[r:r + a.shape[0], :a.shape[1]].set(a)

    sheet = put(sheet, R_WE1, jnp.concatenate([p["We1_y"], p["We1_u"]], axis=0))
    sheet = put(sheet, R_BE1, p["be1"])
    sheet = put(sheet, R_WH, jnp.concatenate([p["Wmu"], p["Wlv"]], axis=1))
    sheet = put(sheet, R_BH, jnp.concatenate([p["bmu"], p["blv"]], axis=1))
    sheet = put(sheet, R_WP1, jnp.concatenate([p["Wp1_x"], p["Wp1_u"]], axis=0))
    sheet = put(sheet, R_BP1, p["bp1"])
    sheet = put(sheet, R_WP2, p["Wp2"])
    sheet = put(sheet, R_BP2, p["bp2"])
    sheet = put(sheet, R_LVP, p["lvp"])
    sheet = put(sheet, R_WDB, jnp.concatenate([p["Wd"], p["Wb"]], axis=1))
    sheet = put(sheet, R_BDB, jnp.concatenate([p["bd"], p["bb"]], axis=1))
    sheet = put(sheet, R_LVDB, jnp.concatenate([p["lvd"], p["lvb"]], axis=1))
    return sheet


def cond_seq_vae_forward(batch, params, eps, beta=1.0):
    """Pallas-backed CondSeqVae.forward for a (y, u, y_behav) batch."""
    y, u, y_behav = batch
    b, t = y.shape[:2]
    # pack [y | u | y_behav | eps] and flatten (B,T,·) -> (B*T,·): one input
    # DMA, and cat(y,u) for the encoder becomes a contiguous column window.
    data = jnp.concatenate([y, u, y_behav, eps], axis=-1)
    data = data.astype(jnp.float32).reshape(b * t, DATA_COLS)
    sheet = pack_params(params)

    # TODO(synk): at production B/T, tile the batch over a "parallel" grid axis
    # (second TensorCore on v7x), re-budget tiles for 64 MiB VMEM via
    # pltpu.CompilerParams(vmem_limit_bytes=...), and cast matmul operands to
    # bf16.  At B=2, T=8 a single un-gridded invocation is fastest.
    sums = pl.pallas_call(
        cond_seq_vae_kernel,
        out_shape=jax.ShapeDtypeStruct((1, 4), jnp.float32),
        in_specs=[pl.BlockSpec(memory_space=pltpu.MemorySpace.VMEM)] * 2,
        out_specs=pl.BlockSpec(memory_space=pltpu.MemorySpace.VMEM),
    )(data, sheet)

    log_q, log_prior = sums[0, 0], sums[0, 1]
    log_like, log_like_behav = sums[0, 2], sums[0, 3]
    # batch mean of per-sequence sums == total sum / B
    elbo = (log_like + beta * (log_prior - log_q)) / b
    return -elbo - log_like_behav / b


def reference_forward(batch, params, eps, beta=1.0):
    """Pure-JAX reference of the same forward (per-batch reductions, mean over B)."""
    y, u, yb = batch
    p = params
    # encoder q(x | y, u)
    yu = jnp.concatenate([y, u], axis=-1)
    W1 = jnp.concatenate([p["We1_y"], p["We1_u"]], axis=0)
    h = jnp.tanh(yu @ W1 + p["be1"])
    mu = h @ p["Wmu"] + p["bmu"]
    logvar = h @ p["Wlv"] + p["blv"]
    x = mu + jnp.exp(0.5 * logvar) * eps
    log_q = jnp.sum(_gauss_logpdf(x, mu, logvar), axis=(-2, -1))
    # conditional prior p(x_{t+1} | x_t, u_t) on cat(x, u)[:, :-1]
    hp = jnp.tanh(x[:, :-1] @ p["Wp1_x"] + u[:, :-1] @ p["Wp1_u"] + p["bp1"])
    mu_p = hp @ p["Wp2"] + p["bp2"]
    log_prior = jnp.sum(_gauss_logpdf(x[:, 1:], mu_p, p["lvp"]), axis=(-2, -1))
    # decoder p(y | x) and behaviour readout p(y_behav | x)
    log_like = jnp.sum(_gauss_logpdf(y, x @ p["Wd"] + p["bd"], p["lvd"]),
                       axis=(-2, -1))
    log_like_behav = jnp.sum(_gauss_logpdf(yb, x @ p["Wb"] + p["bb"], p["lvb"]),
                             axis=(-2, -1))
    elbo = jnp.mean(log_like + beta * (log_prior - log_q))
    return -elbo - jnp.mean(log_like_behav)


def init_params(key):
    shapes = {
        "We1_y": (DY, H_ENC), "We1_u": (DU, H_ENC), "be1": (1, H_ENC),
        "Wmu": (H_ENC, DX), "bmu": (1, DX), "Wlv": (H_ENC, DX), "blv": (1, DX),
        "Wp1_x": (DX, H_PRIOR), "Wp1_u": (DU, H_PRIOR), "bp1": (1, H_PRIOR),
        "Wp2": (H_PRIOR, DX), "bp2": (1, DX), "lvp": (1, DX),
        "Wd": (DX, DY), "bd": (1, DY), "lvd": (1, DY),
        "Wb": (DX, DB), "bb": (1, DB), "lvb": (1, DB),
    }
    params = {}
    keys = jax.random.split(key, len(PARAM_ORDER))
    for k, name in zip(keys, PARAM_ORDER):
        params[name] = (0.1 * jax.random.normal(k, shapes[name])).astype(jnp.float32)
    return params


if __name__ == "__main__":
    # TODO(synk): the prior/encoder/decoder/readout_behav sub-modules are not
    # provided with the reference; they are synthesized as per-timestep MLP /
    # linear-Gaussian heads matching SeqVae's call signatures & reduction axes.
    key = jax.random.PRNGKey(0)
    k_y, k_u, k_b, k_e, k_p = jax.random.split(key, 5)

    y = jax.random.normal(k_y, (B, T, DY), dtype=jnp.float32)
    u = jax.random.normal(k_u, (B, T, DU), dtype=jnp.float32)
    y_behav = jax.random.normal(k_b, (B, T, DB), dtype=jnp.float32)
    eps = jax.random.normal(k_e, (B, T, DX), dtype=jnp.float32)  # reparam noise
    params = init_params(k_p)

    loss = cond_seq_vae_forward((y, u, y_behav), params, eps, beta=1.0)
    loss = jax.block_until_ready(loss)

    loss_ref = reference_forward((y, u, y_behav), params, eps, beta=1.0)
    # tolerance absorbs f32 regrouping / reduction-order differences of the
    # fused kernel vs. the per-batch reference.
    assert jnp.allclose(loss, loss_ref, rtol=1e-3, atol=1e-3), (loss, loss_ref)

    print("KERNEL_OK")
</pallas_src>

<mosaic_0001>
module attributes {stable_mosaic.version = 11 : i64} {
  func.func @cond_seq_vae_kernel(%arg0: memref<16x32xf32, #tpu.memory_space<vmem>>, %arg1: memref<96x32xf32, #tpu.memory_space<vmem>>, %arg2: memref<1x4xf32, #tpu.memory_space<vmem>>) attributes {dimension_semantics = [], scalar_prefetch = 0 : i64, scratch_operands = 0 : i64, tpu.core_type = #tpu.core_type<tc>} {
    %c0 = arith.constant 0 : index
    %c0_0 = arith.constant 0 : index
    %0 = vector.load %arg0[%c0, %c0_0] : memref<16x32xf32, #tpu.memory_space<vmem>>, vector<16x20xf32>
    %c0_1 = arith.constant 0 : index
    %c0_2 = arith.constant 0 : index
    %1 = vector.load %arg0[%c0_1, %c0_2] : memref<16x32xf32, #tpu.memory_space<vmem>>, vector<16x16xf32>
    %c0_3 = arith.constant 0 : index
    %c16 = arith.constant 16 : index
    %2 = vector.load %arg0[%c0_3, %c16] : memref<16x32xf32, #tpu.memory_space<vmem>>, vector<16x4xf32>
    %c0_4 = arith.constant 0 : index
    %c20 = arith.constant 20 : index
    %3 = vector.load %arg0[%c0_4, %c20] : memref<16x32xf32, #tpu.memory_space<vmem>>, vector<16x4xf32>
    %c0_5 = arith.constant 0 : index
    %c24 = arith.constant 24 : index
    %4 = vector.load %arg0[%c0_5, %c24] : memref<16x32xf32, #tpu.memory_space<vmem>>, vector<16x8xf32>
    %c0_6 = arith.constant 0 : index
    %c0_7 = arith.constant 0 : index
    %5 = vector.load %arg1[%c0_6, %c0_7] : memref<96x32xf32, #tpu.memory_space<vmem>>, vector<20x32xf32>
    %cst = arith.constant dense<0.000000e+00> : vector<16x32xf32>
    %6 = tpu.matmul %0, %5, %cst {dimension_numbers = #tpu.dot_dimension_numbers<[1], [0], [0], [1], [0, 0, 1, 1], [], []>} : vector<16x20xf32>, vector<20x32xf32>, vector<16x32xf32> -> vector<16x32xf32>
    %c20_8 = arith.constant 20 : index
    %c0_9 = arith.constant 0 : index
    %7 = vector.load %arg1[%c20_8, %c0_9] : memref<96x32xf32, #tpu.memory_space<vmem>>, vector<1x32xf32>
    %8 = vector.broadcast %7 : vector<1x32xf32> to vector<16x32xf32>
    %9 = arith.addf %6, %8 : vector<16x32xf32>
    %10 = math.tanh %9 : vector<16x32xf32>
    %c21 = arith.constant 21 : index
    %c0_10 = arith.constant 0 : index
    %11 = vector.load %arg1[%c21, %c0_10] : memref<96x32xf32, #tpu.memory_space<vmem>>, vector<32x16xf32>
    %cst_11 = arith.constant dense<0.000000e+00> : vector<16x16xf32>
    %12 = tpu.matmul %10, %11, %cst_11 {dimension_numbers = #tpu.dot_dimension_numbers<[1], [0], [0], [1], [0, 0, 1, 1], [], []>} : vector<16x32xf32>, vector<32x16xf32>, vector<16x16xf32> -> vector<16x16xf32>
    %c53 = arith.constant 53 : index
    %c0_12 = arith.constant 0 : index
    %13 = vector.load %arg1[%c53, %c0_12] : memref<96x32xf32, #tpu.memory_space<vmem>>, vector<1x16xf32>
    %14 = vector.broadcast %13 : vector<1x16xf32> to vector<16x16xf32>
    %15 = arith.addf %12, %14 : vector<16x16xf32>
    %16 = vector.extract_strided_slice %15 {offsets = [0, 0], sizes = [16, 8], strides = [1, 1]} : vector<16x16xf32> to vector<16x8xf32>
    %17 = vector.extract_strided_slice %15 {offsets = [0, 8], sizes = [16, 8], strides = [1, 1]} : vector<16x16xf32> to vector<16x8xf32>
    %cst_13 = arith.constant 5.000000e-01 : f32
    %18 = vector.broadcast %cst_13 : f32 to vector<16x8xf32>
    %19 = arith.mulf %18, %17 : vector<16x8xf32>
    %20 = math.exp %19 : vector<16x8xf32>
    %21 = arith.mulf %20, %4 : vector<16x8xf32>
    %22 = arith.addf %16, %21 : vector<16x8xf32>
    %cst_14 = arith.constant 1.83787704 : f32
    %23 = vector.broadcast %cst_14 : f32 to vector<16x8xf32>
    %24 = arith.addf %23, %17 : vector<16x8xf32>
    %25 = arith.subf %22, %16 : vector<16x8xf32>
    %26 = arith.mulf %25, %25 : vector<16x8xf32>
    %cst_15 = arith.constant 0.000000e+00 : f32
    %27 = vector.broadcast %cst_15 : f32 to vector<16x8xf32>
    %28 = arith.subf %27, %17 : vector<16x8xf32>
    %29 = math.exp %28 : vector<16x8xf32>
    %30 = arith.mulf %26, %29 : vector<16x8xf32>
    %31 = arith.addf %24, %30 : vector<16x8xf32>
    %cst_16 = arith.constant -5.000000e-01 : f32
    %32 = vector.broadcast %cst_16 : f32 to vector<16x8xf32>
    %33 = arith.mulf %32, %31 : vector<16x8xf32>
    %34 = vector.shape_cast %33 : vector<16x8xf32> to vector<1x16x8xf32>
    %cst_17 = arith.constant dense<0.000000e+00> : vector<1xf32>
    %35 = vector.multi_reduction <add>, %34, %cst_17 [1, 2] : vector<1x16x8xf32> to vector<1xf32>
    %36 = vector.shape_cast %35 : vector<1xf32> to vector<1x1x1xf32>
    %37 = vector.extract %36[0, 0, 0] : f32 from vector<1x1x1xf32>
    %38 = vector.broadcast %37 : f32 to vector<1x1xf32>
    %c54 = arith.constant 54 : index
    %c0_18 = arith.constant 0 : index
    %39 = vector.load %arg1[%c54, %c0_18] : memref<96x32xf32, #tpu.memory_space<vmem>>, vector<8x16xf32>
    %cst_19 = arith.constant dense<0.000000e+00> : vector<16x16xf32>
    %40 = tpu.matmul %22, %39, %cst_19 {dimension_numbers = #tpu.dot_dimension_numbers<[1], [0], [0], [1], [0, 0, 1, 1], [], []>} : vector<16x8xf32>, vector<8x16xf32>, vector<16x16xf32> -> vector<16x16xf32>
    %c62 = arith.constant 62 : index
    %c0_20 = arith.constant 0 : index
    %41 = vector.load %arg1[%c62, %c0_20] : memref<96x32xf32, #tpu.memory_space<vmem>>, vector<4x16xf32>
    %cst_21 = arith.constant dense<0.000000e+00> : vector<16x16xf32>
    %42 = tpu.matmul %2, %41, %cst_21 {dimension_numbers = #tpu.dot_dimension_numbers<[1], [0], [0], [1], [0, 0, 1, 1], [], []>} : vector<16x4xf32>, vector<4x16xf32>, vector<16x16xf32> -> vector<16x16xf32>
    %43 = arith.addf %40, %42 : vector<16x16xf32>
    %c66 = arith.constant 66 : index
    %c0_22 = arith.constant 0 : index
    %44 = vector.load %arg1[%c66, %c0_22] : memref<96x32xf32, #tpu.memory_space<vmem>>, vector<1x16xf32>
    %45 = vector.broadcast %44 : vector<1x16xf32> to vector<16x16xf32>
    %46 = arith.addf %43, %45 : vector<16x16xf32>
    %47 = math.tanh %46 : vector<16x16xf32>
    %c67 = arith.constant 67 : index
    %c0_23 = arith.constant 0 : index
    %48 = vector.load %arg1[%c67, %c0_23] : memref<96x32xf32, #tpu.memory_space<vmem>>, vector<16x8xf32>
    %cst_24 = arith.constant dense<0.000000e+00> : vector<16x8xf32>
    %49 = tpu.matmul %47, %48, %cst_24 {dimension_numbers = #tpu.dot_dimension_numbers<[1], [0], [0], [1], [0, 0, 1, 1], [], []>} : vector<16x16xf32>, vector<16x8xf32>, vector<16x8xf32> -> vector<16x8xf32>
    %c83 = arith.constant 83 : index
    %c0_25 = arith.constant 0 : index
    %50 = vector.load %arg1[%c83, %c0_25] : memref<96x32xf32, #tpu.memory_space<vmem>>, vector<1x8xf32>
    %51 = vector.broadcast %50 : vector<1x8xf32> to vector<16x8xf32>
    %52 = arith.addf %49, %51 : vector<16x8xf32>
    %c84 = arith.constant 84 : index
    %c0_26 = arith.constant 0 : index
    %53 = vector.load %arg1[%c84, %c0_26] : memref<96x32xf32, #tpu.memory_space<vmem>>, vector<1x8xf32>
    %54 = tpu.iota {dimensions = array<i32: 0>} : vector<16x16xi32>
    %55 = tpu.iota {dimensions = array<i32: 1>} : vector<16x16xi32>
    %c1_i32 = arith.constant 1 : i32
    %56 = vector.broadcast %c1_i32 : i32 to vector<16x16xi32>
    %57 = arith.addi %54, %56 : vector<16x16xi32>
    %58 = arith.cmpi eq, %55, %57 : vector<16x16xi32>
    %cst_27 = arith.constant 1.000000e+00 : f32
    %cst_28 = arith.constant 0.000000e+00 : f32
    %59 = vector.broadcast %cst_27 : f32 to vector<16x16xf32>
    %60 = vector.broadcast %cst_28 : f32 to vector<16x16xf32>
    %61 = arith.select %58, %59, %60 : vector<16x16xi1>, vector<16x16xf32>
    %cst_29 = arith.constant dense<0.000000e+00> : vector<16x8xf32>
    %62 = tpu.matmul %61, %22, %cst_29 {dimension_numbers = #tpu.dot_dimension_numbers<[1], [0], [0], [1], [0, 0, 1, 1], [], []>} : vector<16x16xf32>, vector<16x8xf32>, vector<16x8xf32> -> vector<16x8xf32>
    %63 = tpu.iota {dimensions = array<i32: 0>} : vector<16x8xi32>
    %c8_i32 = arith.constant 8 : i32
    %c0_i32 = arith.constant 0 : i32
    %64 = arith.cmpi eq, %c8_i32, %c0_i32 : i32
    %c1_i32_30 = arith.constant 1 : i32
    %65 = arith.select %64, %c1_i32_30, %c8_i32 : i32
    %66 = vector.broadcast %65 : i32 to vector<16x8xi32>
    %67 = arith.remsi %63, %66 : vector<16x8xi32>
    %c0_i32_31 = arith.constant 0 : i32
    %68 = vector.broadcast %c0_i32_31 : i32 to vector<16x8xi32>
    %69 = arith.cmpi ne, %67, %68 : vector<16x8xi32>
    %c0_i32_32 = arith.constant 0 : i32
    %70 = vector.broadcast %c0_i32_32 : i32 to vector<16x8xi32>
    %71 = arith.cmpi slt, %67, %70 : vector<16x8xi32>
    %c0_i32_33 = arith.constant 0 : i32
    %72 = arith.cmpi slt, %65, %c0_i32_33 : i32
    %73 = vector.broadcast %72 : i1 to vector<16x8xi1>
    %74 = vector.broadcast %73 : vector<16x8xi1> to vector<16x8xi1>
    %75 = arith.xori %71, %74 : vector<16x8xi1>
    %76 = arith.andi %75, %69 : vector<16x8xi1>
    %77 = vector.broadcast %65 : i32 to vector<16x8xi32>
    %78 = arith.addi %67, %77 : vector<16x8xi32>
    %79 = arith.select %76, %78, %67 : vector<16x8xi1>, vector<16x8xi32>
    %c7_i32 = arith.constant 7 : i32
    %80 = vector.broadcast %c7_i32 : i32 to vector<16x8xi32>
    %81 = arith.cmpi ne, %79, %80 : vector<16x8xi32>
    %cst_34 = arith.constant 1.83787704 : f32
    %82 = vector.broadcast %cst_34 : f32 to vector<1x8xf32>
    %83 = arith.addf %82, %53 : vector<1x8xf32>
    %84 = arith.subf %62, %52 : vector<16x8xf32>
    %85 = arith.mulf %84, %84 : vector<16x8xf32>
    %cst_35 = arith.constant 0.000000e+00 : f32
    %86 = vector.broadcast %cst_35 : f32 to vector<1x8xf32>
    %87 = arith.subf %86, %53 : vector<1x8xf32>
    %88 = math.exp %87 : vector<1x8xf32>
    %89 = vector.broadcast %88 : vector<1x8xf32> to vector<16x8xf32>
    %90 = arith.mulf %85, %89 : vector<16x8xf32>
    %91 = vector.broadcast %83 : vector<1x8xf32> to vector<16x8xf32>
    %92 = arith.addf %91, %90 : vector<16x8xf32>
    %cst_36 = arith.constant -5.000000e-01 : f32
    %93 = vector.broadcast %cst_36 : f32 to vector<16x8xf32>
    %94 = arith.mulf %93, %92 : vector<16x8xf32>
    %cst_37 = arith.constant 0.000000e+00 : f32
    %95 = vector.broadcast %cst_37 : f32 to vector<16x8xf32>
    %96 = arith.select %81, %94, %95 : vector<16x8xi1>, vector<16x8xf32>
    %97 = vector.shape_cast %96 : vector<16x8xf32> to vector<1x16x8xf32>
    %cst_38 = arith.constant dense<0.000000e+00> : vector<1xf32>
    %98 = vector.multi_reduction <add>, %97, %cst_38 [1, 2] : vector<1x16x8xf32> to vector<1xf32>
    %99 = vector.shape_cast %98 : vector<1xf32> to vector<1x1x1xf32>
    %100 = vector.extract %99[0, 0, 0] : f32 from vector<1x1x1xf32>
    %101 = vector.broadcast %100 : f32 to vector<1x1xf32>
    %c85 = arith.constant 85 : index
    %c0_39 = arith.constant 0 : index
    %102 = vector.load %arg1[%c85, %c0_39] : memref<96x32xf32, #tpu.memory_space<vmem>>, vector<8x20xf32>
    %cst_40 = arith.constant dense<0.000000e+00> : vector<16x20xf32>
    %103 = tpu.matmul %22, %102, %cst_40 {dimension_numbers = #tpu.dot_dimension_numbers<[1], [0], [0], [1], [0, 0, 1, 1], [], []>} : vector<16x8xf32>, vector<8x20xf32>, vector<16x20xf32> -> vector<16x20xf32>
    %c93 = arith.constant 93 : index
    %c0_41 = arith.constant 0 : index
    %104 = vector.load %arg1[%c93, %c0_41] : memref<96x32xf32, #tpu.memory_space<vmem>>, vector<1x20xf32>
    %105 = vector.broadcast %104 : vector<1x20xf32> to vector<16x20xf32>
    %106 = arith.addf %103, %105 : vector<16x20xf32>
    %c94 = arith.constant 94 : index
    %c0_42 = arith.constant 0 : index
    %107 = vector.load %arg1[%c94, %c0_42] : memref<96x32xf32, #tpu.memory_space<vmem>>, vector<1x20xf32>
    %108 = vector.extract_strided_slice %106 {offsets = [0, 0], sizes = [16, 16], strides = [1, 1]} : vector<16x20xf32> to vector<16x16xf32>
    %109 = vector.extract_strided_slice %107 {offsets = [0, 0], sizes = [1, 16], strides = [1, 1]} : vector<1x20xf32> to vector<1x16xf32>
    %cst_43 = arith.constant 1.83787704 : f32
    %110 = vector.broadcast %cst_43 : f32 to vector<1x16xf32>
    %111 = arith.addf %110, %109 : vector<1x16xf32>
    %112 = arith.subf %1, %108 : vector<16x16xf32>
    %113 = arith.mulf %112, %112 : vector<16x16xf32>
    %cst_44 = arith.constant 0.000000e+00 : f32
    %114 = vector.broadcast %cst_44 : f32 to vector<1x16xf32>
    %115 = arith.subf %114, %109 : vector<1x16xf32>
    %116 = math.exp %115 : vector<1x16xf32>
    %117 = vector.broadcast %116 : vector<1x16xf32> to vector<16x16xf32>
    %118 = arith.mulf %113, %117 : vector<16x16xf32>
    %119 = vector.broadcast %111 : vector<1x16xf32> to vector<16x16xf32>
    %120 = arith.addf %119, %118 : vector<16x16xf32>
    %cst_45 = arith.constant -5.000000e-01 : f32
    %121 = vector.broadcast %cst_45 : f32 to vector<16x16xf32>
    %122 = arith.mulf %121, %120 : vector<16x16xf32>
    %123 = vector.shape_cast %122 : vector<16x16xf32> to vector<1x16x16xf32>
    %cst_46 = arith.constant dense<0.000000e+00> : vector<1xf32>
    %124 = vector.multi_reduction <add>, %123, %cst_46 [1, 2] : vector<1x16x16xf32> to vector<1xf32>
    %125 = vector.shape_cast %124 : vector<1xf32> to vector<1x1x1xf32>
    %126 = vector.extract %125[0, 0, 0] : f32 from vector<1x1x1xf32>
    %127 = vector.broadcast %126 : f32 to vector<1x1xf32>
    %128 = vector.extract_strided_slice %106 {offsets = [0, 16], sizes = [16, 4], strides = [1, 1]} : vector<16x20xf32> to vector<16x4xf32>
    %129 = vector.extract_strided_slice %107 {offsets = [0, 16], sizes = [1, 4], strides = [1, 1]} : vector<1x20xf32> to vector<1x4xf32>
    %cst_47 = arith.constant 1.83787704 : f32
    %130 = vector.broadcast %cst_47 : f32 to vector<1x4xf32>
    %131 = arith.addf %130, %129 : vector<1x4xf32>
    %132 = arith.subf %3, %128 : vector<16x4xf32>
    %133 = arith.mulf %132, %132 : vector<16x4xf32>
    %cst_48 = arith.constant 0.000000e+00 : f32
    %134 = vector.broadcast %cst_48 : f32 to vector<1x4xf32>
    %135 = arith.subf %134, %129 : vector<1x4xf32>
    %136 = math.exp %135 : vector<1x4xf32>
    %137 = vector.broadcast %136 : vector<1x4xf32> to vector<16x4xf32>
    %138 = arith.mulf %133, %137 : vector<16x4xf32>
    %139 = vector.broadcast %131 : vector<1x4xf32> to vector<16x4xf32>
    %140 = arith.addf %139, %138 : vector<16x4xf32>
    %cst_49 = arith.constant -5.000000e-01 : f32
    %141 = vector.broadcast %cst_49 : f32 to vector<16x4xf32>
    %142 = arith.mulf %141, %140 : vector<16x4xf32>
    %143 = vector.shape_cast %142 : vector<16x4xf32> to vector<1x16x4xf32>
    %cst_50 = arith.constant dense<0.000000e+00> : vector<1xf32>
    %144 = vector.multi_reduction <add>, %143, %cst_50 [1, 2] : vector<1x16x4xf32> to vector<1xf32>
    %145 = vector.shape_cast %144 : vector<1xf32> to vector<1x1x1xf32>
    %146 = vector.extract %145[0, 0, 0] : f32 from vector<1x1x1xf32>
    %147 = vector.broadcast %146 : f32 to vector<1x1xf32>
    %148 = tpu.iota {dimensions = array<i32: 1>} : vector<1x4xi32>
    %c0_i32_51 = arith.constant 0 : i32
    %149 = vector.broadcast %c0_i32_51 : i32 to vector<1x4xi32>
    %150 = arith.cmpi eq, %148, %149 : vector<1x4xi32>
    %cst_52 = arith.constant 0.000000e+00 : f32
    %151 = vector.shape_cast %38 : vector<1x1xf32> to vector<1x1xf32>
    %152 = vector.broadcast %151 : vector<1x1xf32> to vector<1x4xf32>
    %153 = vector.broadcast %cst_52 : f32 to vector<1x4xf32>
    %154 = arith.select %150, %152, %153 : vector<1x4xi1>, vector<1x4xf32>
    %c1_i32_53 = arith.constant 1 : i32
    %155 = vector.broadcast %c1_i32_53 : i32 to vector<1x4xi32>
    %156 = arith.cmpi eq, %148, %155 : vector<1x4xi32>
    %cst_54 = arith.constant 0.000000e+00 : f32
    %157 = vector.shape_cast %101 : vector<1x1xf32> to vector<1x1xf32>
    %158 = vector.broadcast %157 : vector<1x1xf32> to vector<1x4xf32>
    %159 = vector.broadcast %cst_54 : f32 to vector<1x4xf32>
    %160 = arith.select %156, %158, %159 : vector<1x4xi1>, vector<1x4xf32>
    %161 = arith.addf %154, %160 : vector<1x4xf32>
    %c2_i32 = arith.constant 2 : i32
    %162 = vector.broadcast %c2_i32 : i32 to vector<1x4xi32>
    %163 = arith.cmpi eq, %148, %162 : vector<1x4xi32>
    %cst_55 = arith.constant 0.000000e+00 : f32
    %164 = vector.shape_cast %127 : vector<1x1xf32> to vector<1x1xf32>
    %165 = vector.broadcast %164 : vector<1x1xf32> to vector<1x4xf32>
    %166 = vector.broadcast %cst_55 : f32 to vector<1x4xf32>
    %167 = arith.select %163, %165, %166 : vector<1x4xi1>, vector<1x4xf32>
    %168 = arith.addf %161, %167 : vector<1x4xf32>
    %c3_i32 = arith.constant 3 : i32
    %169 = vector.broadcast %c3_i32 : i32 to vector<1x4xi32>
    %170 = arith.cmpi eq, %148, %169 : vector<1x4xi32>
    %cst_56 = arith.constant 0.000000e+00 : f32
    %171 = vector.shape_cast %147 : vector<1x1xf32> to vector<1x1xf32>
    %172 = vector.broadcast %171 : vector<1x1xf32> to vector<1x4xf32>
    %173 = vector.broadcast %cst_56 : f32 to vector<1x4xf32>
    %174 = arith.select %170, %172, %173 : vector<1x4xi1>, vector<1x4xf32>
    %175 = arith.addf %168, %174 : vector<1x4xf32>
    %c0_57 = arith.constant 0 : index
    %c0_58 = arith.constant 0 : index
    %176 = vector.load %arg2[%c0_57, %c0_58] : memref<1x4xf32, #tpu.memory_space<vmem>>, vector<1x4xf32>
    tpu.vector_store %arg2[%c0_57, %c0_58], %175 {strides = array<i32>} : memref<1x4xf32, #tpu.memory_space<vmem>>, vector<1x4xf32>,
    return
  }
}

</mosaic_0001>

<bundles_post_ra>
// kernel: tpu_custom_call.1
= control target key start
LH: loop header
LB: loop body
LE: loop exit
PB: predicated region body
PF: predicated region fallthrough
CT: control target
= control target key end

     0   :  { %vm26_vm0 = vcmask 1043456   ;;  %vm19_vm1 = vcmask 162816   ;;  %s766_s0 = inlined_call_operand.vmem [shape: f32[16,32], index: 0, kind: input, shape index: {}]   ;;  %s767_s1 = inlined_call_operand.vmem [shape: f32[96,32], index: 1, kind: input, shape index: {}]   ;;  %s768_s2 = inlined_call_operand.hbm [shape: f32[1,4], index: 2, kind: output, shape index: {}]  }
   0x1   :  { %v16_v0 = vld [vmem:[%s767_s1 + $0x10] sm:$0xf]  ;;  %v15_v1 = vld [vmem:[%s767_s1 + $0x8] sm:$0xff]  ;;  %v14_v2 = vld [vmem:[%s767_s1] sm:$0xff] }
   0x2   :  { %507 = vmatpush.msk.msra.mxu0 %vm26_vm0, %v16_v0  ;;  %v627_v3 = vld [vmem:[%s766_s0] sm:$0xff]  ;;  %523 = vmatpush.msk.msra.mxu1 %vm26_vm0, %v16_v0  ;;  %v633_v4 = vld [vmem:[%s766_s0 + $0x8] sm:$0xff] }
   0x4   :  { %44 = vmatpush.msra.mxu0 %v15_v1  ;;  %524 = vmatpush.msra.mxu1 %v15_v1 }
   0x5   :  { %7 = vsyncpa [#allocation3], 0  ;;  %s592_s19 = smov 112   ;;  %v58_v5 = vld [vmem:[%s767_s1 + $0x2d] sm:$0xff]  ;;  %v57_v6 = vld [vmem:[%s767_s1 + $0x25] sm:$0xff]  ;;  %vm61_vm2 = vcmask 261120   ;;  %v273_v49 = vlaneseq }
   0x6   :  { %45 = vmatpush.msra.mxu0 %v14_v2  ;;  %525 = vmatpush.msra.mxu1 %v14_v2  ;;  %v56_v7 = vld [vmem:[%s767_s1 + $0x1d] sm:$0xff]  ;;  %v55_v8 = vld [vmem:[%s767_s1 + $0x15] sm:$0xff]  ;;  %v541_v9 = vld [vmem:[%s767_s1 + $0x14] ss:$0 sm:$0xff]  ;;  %vm172_vm3 = vcmask 31744   ;;  %s593_s5 = smov 120  }
   0x7   :  { %508 = vmatmul.msk.f32.vlgmr.msra.gmra.mxu0 %vm19_vm1, %v627_v3  ;;  %509 = vmatmul.msk.f32.vlgmr.msra.gmra.mxu1 %vm19_vm1, %v633_v4  ;;  %v171_v16 = vld [vmem:[%s767_s1 + $0x3e] sm:$0xf]  ;;  %v542_v19 = vld [vmem:[%s767_s1 + $0x35] ss:$0 sm:$0xff]  ;;  %v170_v39 = vld [vmem:[%s767_s1 + $0x36] sm:$0xff]  ;;  %vm157_vm4 = vcmask 64512  }
   0x8   :  { %97 = vrot.lane.b32.xlu0 %v627_v3, %s592_s19  ;;  %80 = vmatpush.msrb.mxu1 %v58_v5  ;;  %v369_v38 = vld [vmem:[%s767_s1 + $0x55] sm:$0xff]  ;;  %v395_v44 = vld [vmem:[%s767_s1 + $0x5e] sm:$0x1]  ;;  %s594_s12 = smov 4   ;;  %v239_v50 = vld [vmem:[%s767_s1 + $0x4b] sm:$0xff]  ;;  %v696_v51 = vshrl.u32 %v273_v49, 7 }
   0x9   :  { %512 = vmatpush.msk.msra.mxu2 %vm26_vm0, %v171_v16  ;;  %387 = vmatpush.msrb.mxu0 %v369_v38  ;;  %v401_v45 = vsub.f32 0.0, %v395_v44  ;;  %v238_v52 = vld [vmem:[%s767_s1 + $0x43] sm:$0xff]  ;;  %v701_v53 = vand.u32 127, %v273_v49  ;;  %vm242_vm6 = vcmask 130048   ;;  %v595_v55 = vmov 0.0   ;;  %s596_s0 = smov 8  }
   0xa   :  { %81 = vmatpush.msrb.mxu1 %v57_v6  ;;  %224 = vmatpush.msra.mxu3 %v170_v39  ;;  %v278_v54 = vadd.s32 1, %v696_v51  ;;  %v707_v57 = vadd.s32 8, %v696_v51  ;;  %v543_v60 = vld [vmem:[%s767_s1 + $0x5d] ss:$0 sm:$0xff]  ;;  %v396_v0 = vadd.f32 1.837877, %v395_v44 }
   0xb   :  { %v402_v46 = vmul.f32 1.442695, %v401_v45  ;;  %263 = vmatpush.msrb.mxu2 %v239_v50  ;;  %s597_s22 = smov 124   ;;  %vm477_vm10 = vcmp.eq.s32.totalorder %v701_v53, 1  ;;  %vm474_vm11 = vcmp.eq.s32.totalorder %v701_v53, 0  ;;  %vm481_vm12 = vcmp.eq.s32.totalorder %v701_v53, 2 }
   0xc   :  { %82 = vmatpush.msrb.mxu1 %v56_v7  ;;  %vm280_vm5 = vcmp.eq.s32.totalorder %v701_v53, %v278_v54  ;;  %v279_v58 = vadd.s32 1, %v707_v57  ;;  %v544_v7 = vld [vmem:[%s767_s1 + $0x42] ss:$0 sm:$0xff]  ;;  %vm485_vm13 = vcmp.eq.s32.totalorder %v701_v53, 3  ;;  %s598_s28 = smov [#allocation2]   ;;  %vm489_vm14 = vcmask 24576  }
   0xd   :  { %264 = vmatpush.msrb.mxu2 %v238_v52  ;;  %v282_v56 = vsel %vm280_vm5, 1.0, %v595_v55  ;;  %s496_s29 = sshll.u32 %s598_s28, 4  ;;  %s497_s29 = int_to_ptr.vmem [resolvable:$true] %s496_s29 }
   0xe   :  { %83 = vmatpush.msrb.mxu1 %v55_v8  ;;  %vm281_vm7 = vcmp.eq.s32.totalorder %v701_v53, %v279_v58  ;;  %v721_v8 = vperm.slane %v396_v0, 0  ;;  %v545_v0 = vld [vmem:[%s767_s1 + $0x53] ss:$0 sm:$0xff] }
   0xf   :  { %v283_v59 = vsel %vm281_vm7, 1.0, %v595_v55 }
  0x10   :  { %99 = vrot.lane.b32.xlu0 %v633_v4, %s592_s19 }
  0x7a   :  { %v98_v17 = vpop.permute.xlu0 %97 }
  0x7b   :  { %513 = vmatmul.msk.f32.vlgmr.msra.gmra.mxu2 %vm172_vm3, %v98_v17 }
  0x82   :  { %v100_v18 = vpop.permute.xlu0 %99 }
  0x83   :  { %514 = vmatmul.msk.f32.gmra.mxu2 %vm172_vm3, %v100_v18 }
  0x84   :  { %v47_v10 = vpop.f32.mrf.mxu0  ;;  %v50_v12 = vpop.f32.mrf.mxu1 }
  0x85   :  { %v48_v11 = vadd.f32 %v541_v9, %v47_v10  ;;  %v51_v13 = vadd.f32 %v541_v9, %v50_v12 }
  0x87   :  { %546 = vtanh.f32 %v48_v11 }
  0x88   :  { %548 = vtanh.f32 %v51_v13 }
  0x8d   :  { %v547_v14 = vpop.eup %546 }
  0x8e   :  { %510 = vmatmul.msk.f32.vlgmr.msrb.gmra.mxu1 %vm61_vm2, %v547_v14  ;;  %v549_v15 = vpop.eup %548 }
  0x96   :  { %511 = vmatmul.msk.f32.gmra.mxu1 %vm61_vm2, %v549_v15 }
  0xfe   :  { %v197_v2 = vpop.f32.mrf.mxu2 }
 0x10b   :  { %v85_v20 = vpop.f32.mrf.mxu1 }
 0x10c   :  { %v665_v21 = vadd.f32 %v542_v19, %v85_v20 }
 0x10e   :  { %v121_v22 = vsub.f32 0.0, %v665_v21  ;;  %v91_v23 = vmul.f32 0.5, %v665_v21  ;;  %v115_v44 = vadd.f32 1.837877, %v665_v21 }
 0x110   :  { %v123_v24 = vmul.f32 1.442695, %v121_v22  ;;  %v93_v25 = vmul.f32 1.442695, %v91_v23 }
 0x112   :  { %550 = vpow2.f32 %v123_v24 }
 0x113   :  { %v88_v26 = vpop.f32.mrf.mxu1  ;;  %552 = vpow2.f32 %v93_v25  ;;  %v200_v25 = vpop.f32.mrf.mxu2 }
 0x114   :  { %v669_v27 = vadd.f32 %v542_v19, %v88_v26 }
 0x116   :  { %v122_v28 = vsub.f32 0.0, %v669_v27  ;;  %v92_v29 = vmul.f32 0.5, %v669_v27 }
 0x118   :  { %v551_v30 = vpop.eup %550  ;;  %v125_v31 = vmul.f32 1.442695, %v122_v28  ;;  %v95_v32 = vmul.f32 1.442695, %v92_v29 }
 0x119   :  { %v553_v33 = vpop.eup %552  ;;  %129 = vrot.lane.b32.xlu2 %v551_v30, %s593_s5 }
 0x11a   :  { %554 = vpow2.f32 %v125_v31  ;;  %v103_v34 = vmul.f32 %v553_v33, %v98_v17 }
 0x11b   :  { %556 = vpow2.f32 %v95_v32 }
 0x11c   :  { %107 = vrot.lane.b32.xlu1 %v103_v34, %s593_s5  ;;  %558 = vpow2.f32 %v402_v46 }
 0x120   :  { %v555_v35 = vpop.eup %554 }
 0x121   :  { %v557_v36 = vpop.eup %556  ;;  %131 = vrot.lane.b32.xlu2 %v555_v35, %s593_s5 }
 0x122   :  { %v104_v37 = vmul.f32 %v557_v36, %v100_v18  ;;  %v559_v47 = vpop.eup %558 }
 0x123   :  { %v404_v48 = vperm.slane %v559_v47, 0 }
 0x124   :  { %109 = vrot.lane.b32.xlu1 %v104_v37, %s593_s5 }
 0x129   :  { %437 = vrot.lane.b32.xlu2 %v404_v48, %s594_s12 }
 0x173   :  { %v130_v9 = vpop.permute.xlu2 %129 }
 0x17b   :  { %v132_v30 = vpop.permute.xlu2 %131 }
 0x18e   :  { %v108_v40 = vpop.permute.xlu1 %107 }
 0x18f   :  { %v113_v41 = vadd.f32 %v108_v40, %v665_v21 }
 0x191   :  { %515 = vmatmul.msk.f32.vlgmr.msra.gmra.mxu3 %vm157_vm4, %v113_v41  ;;  %521 = vmatmul.msk.f32.vlgmr.msrb.gmra.mxu0 %vm157_vm4, %v113_v41  ;;  %v117_v62 = vsub.f32 %v113_v41, %v665_v21 }
 0x193   :  { %v119_v5 = vmul.f32 %v117_v62, %v117_v62 }
 0x195   :  { %v135_v14 = vmul.f32 %v130_v9, %v119_v5 }
 0x196   :  { %v110_v42 = vpop.permute.xlu1 %109 }
 0x197   :  { %v114_v43 = vadd.f32 %v110_v42, %v669_v27 }
 0x199   :  { %516 = vmatmul.msk.f32.gmra.mxu3 %vm157_vm4, %v114_v43  ;;  %522 = vmatmul.msk.f32.gmra.mxu0 %vm157_vm4, %v114_v43  ;;  %v118_v17 = vsub.f32 %v114_v43, %v669_v27 }
 0x19a   :  { %304 = vmatpush.msrb.mxu3 %v114_v43 }
 0x19b   :  { %v120_v23 = vmul.f32 %v118_v17, %v118_v17 }
 0x19c   :  { %305 = vmatpush.msrb.mxu3 %v113_v41  ;;  %v438_v41 = vpop.permute.xlu2 %437 }
 0x19d   :  { %v136_v33 = vmul.f32 %v132_v30, %v120_v23 }
 0x1a1   :  { %519 = vmatmul.msk.f32.vlgmr.msrb.gmra.mxu3 %vm242_vm6, %v282_v56 }
 0x1a9   :  { %520 = vmatmul.msk.f32.gmra.mxu3 %vm242_vm6, %v283_v59 }
 0x20e   :  { %v389_v61 = vpop.f32.mrf.mxu0 }
 0x20f   :  { %v390_v63 = vadd.f32 %v543_v60, %v389_v61 }
 0x211   :  { %v397_v1 = vsub.f32 %v627_v3, %v390_v63  ;;  %426 = vrot.lane.b32.xlu0 %v390_v63, %s594_s12 }
 0x213   :  { %v399_v6 = vmul.f32 %v397_v1, %v397_v1 }
 0x214   :  { %v226_v10 = vpop.f32.mrf.mxu3 }
 0x215   :  { %v227_v11 = vadd.f32 %v226_v10, %v197_v2  ;;  %v405_v12 = vmul.f32 %v404_v48, %v399_v6 }
 0x216   :  { %v392_v13 = vpop.f32.mrf.mxu0 }
 0x217   :  { %v234_v15 = vadd.f32 %v544_v7, %v227_v11  ;;  %v393_v16 = vadd.f32 %v543_v60, %v392_v13  ;;  %v408_v18 = vadd.f32 %v721_v8, %v405_v12 }
 0x219   :  { %560 = vtanh.f32 %v234_v15  ;;  %v398_v19 = vsub.f32 %v633_v4, %v393_v16  ;;  %139 = vrot.lane.b32.xlu0 %v135_v14, %s596_s0  ;;  %428 = vrot.lane.b32.xlu1 %v393_v16, %s594_s12  ;;  %v410_v20 = vmul.f32 -0.5, %v408_v18 }
 0x21b   :  { %v400_v22 = vmul.f32 %v398_v19, %v398_v19  ;;  %v412_v24 = vsel %vm242_vm6, %v410_v20, 0.0 }
 0x21c   :  { %v229_v26 = vpop.f32.mrf.mxu3 }
 0x21d   :  { %v230_v28 = vadd.f32 %v229_v26, %v200_v25  ;;  %v406_v29 = vmul.f32 %v404_v48, %v400_v22  ;;  %v324_v25 = vand.u32 7, %v707_v57 }
 0x21f   :  { %v561_v31 = vpop.eup %560  ;;  %v235_v32 = vadd.f32 %v544_v7, %v230_v28  ;;  %v409_v34 = vadd.f32 %v721_v8, %v406_v29  ;;  %v317_v29 = vand.u32 7, %v696_v51  ;;  %vm338_vm8 = vcmp.ne.s32.totalorder %v324_v25, 7 }
 0x220   :  { %517 = vmatmul.msk.f32.vlgmr.msrb.gmra.mxu2 %vm242_vm6, %v561_v31 }
 0x221   :  { %562 = vtanh.f32 %v235_v32  ;;  %141 = vrot.lane.b32.xlu1 %v136_v33, %s596_s0  ;;  %v411_v35 = vmul.f32 -0.5, %v409_v34  ;;  %vm337_vm9 = vcmp.ne.s32.totalorder %v317_v29, 7 }
 0x223   :  { %v413_v36 = vsel %vm242_vm6, %v411_v35, 0.0 }
 0x224   :  { %v731_v37 = vadd.f32 %v413_v36, %v412_v24  ;;  %v307_v61 = vpop.f32.mrf.mxu3 }
 0x227   :  { %v563_v38 = vpop.eup %562 }
 0x228   :  { %518 = vmatmul.msk.f32.gmra.mxu2 %vm242_vm6, %v563_v38 }
 0x22c   :  { %v310_v2 = vpop.f32.mrf.mxu3 }
 0x283   :  { %v427_v39 = vpop.permute.xlu0 %426 }
 0x284   :  { %v432_v40 = vsub.f32 %v627_v3, %v427_v39  ;;  %v116_v3 = vadd.f32 1.837877, %v669_v27 }
 0x286   :  { %v434_v42 = vmul.f32 %v432_v40, %v432_v40 }
 0x288   :  { %v440_v43 = vmul.f32 %v438_v41, %v434_v42 }
 0x28a   :  { %444 = vrot.lane.b32.xlu2 %v440_v43, %s597_s22 }
 0x28b   :  { %v140_v45 = vpop.permute.xlu0 %139  ;;  %v429_v46 = vpop.permute.xlu1 %428 }
 0x28c   :  { %v145_v47 = vadd.f32 %v140_v45, %v115_v44  ;;  %v433_v48 = vsub.f32 %v633_v4, %v429_v46  ;;  %v272_v4 = vld [vmem:[%s767_s1 + $0x54] sm:$0x1] }
 0x28d   :  { %v344_v62 = vsub.f32 0.0, %v272_v4  ;;  %v339_v11 = vadd.f32 1.837877, %v272_v4 }
 0x28e   :  { %v147_v49 = vmul.f32 -0.5, %v145_v47  ;;  %v435_v50 = vmul.f32 %v433_v48, %v433_v48 }
 0x28f   :  { %v345_v63 = vmul.f32 1.442695, %v344_v62  ;;  %v350_v17 = vperm.slane %v339_v11, 0 }
 0x290   :  { %v441_v52 = vmul.f32 %v438_v41, %v435_v50  ;;  %151 = vrot.lane.b32.xlu1 %v147_v49, %s593_s5 }
 0x291   :  { %564 = vpow2.f32 %v345_v63 }
 0x292   :  { %446 = vrot.lane.b32.xlu0 %v441_v52, %s597_s22 }
 0x293   :  { %v142_v54 = vpop.permute.xlu1 %141 }
 0x294   :  { %v146_v55 = vadd.f32 %v142_v54, %v116_v3 }
 0x296   :  { %v148_v56 = vmul.f32 -0.5, %v146_v55 }
 0x297   :  { %v565_v9 = vpop.eup %564 }
 0x298   :  { %153 = vrot.lane.b32.xlu2 %v148_v56, %s593_s5  ;;  %v347_v13 = vperm.slane %v565_v9, 0  ;;  %s498_s5 = sshll.u32 %s768_s2, 4  ;;  %s499_s5 = int_to_ptr.hbm [resolvable:$true] %s498_s5 }
 0x2a3   :  { %v266_v59 = vpop.f32.mrf.mxu2 }
 0x2a4   :  { %v267_v5 = vadd.f32 %v545_v0, %v266_v59 }
 0x2a6   :  { %v340_v7 = vsub.f32 %v307_v61, %v267_v5 }
 0x2a8   :  { %v342_v12 = vmul.f32 %v340_v7, %v340_v7 }
 0x2aa   :  { %v348_v16 = vmul.f32 %v347_v13, %v342_v12 }
 0x2ab   :  { %v269_v27 = vpop.f32.mrf.mxu2 }
 0x2ac   :  { %v270_v1 = vadd.f32 %v545_v0, %v269_v27  ;;  %v351_v26 = vadd.f32 %v350_v17, %v348_v16 }
 0x2ae   :  { %v341_v6 = vsub.f32 %v310_v2, %v270_v1  ;;  %v353_v32 = vmul.f32 -0.5, %v351_v26 }
 0x2b0   :  { %v343_v10 = vmul.f32 %v341_v6, %v341_v6  ;;  %v355_v34 = vsel %vm337_vm9, %v353_v32, 0.0 }
 0x2b1   :  { %v357_v36 = vsel %vm157_vm4, %v355_v34, 0.0 }
 0x2b2   :  { %v349_v14 = vmul.f32 %v347_v13, %v343_v10 }
 0x2b4   :  { %v352_v19 = vadd.f32 %v350_v17, %v349_v14 }
 0x2b6   :  { %v354_v31 = vmul.f32 -0.5, %v352_v19 }
 0x2b8   :  { %v356_v33 = vsel %vm338_vm8, %v354_v31, 0.0 }
 0x2b9   :  { %v358_v35 = vsel %vm157_vm4, %v356_v33, 0.0 }
 0x2ba   :  { %v359_v57 = vadd.f32 %v358_v35, %v357_v36 }
 0x2e4   :  { %v445_v58 = vpop.permute.xlu2 %444 }
 0x2e5   :  { %v450_v21 = vadd.f32 %v445_v58, %v721_v8 }
 0x2e7   :  { %v452_v60 = vmul.f32 -0.5, %v450_v21 }
 0x2e9   :  { %456 = vrot.lane.b32.xlu0 %v452_v60, %s592_s19 }
 0x2f2   :  { %v154_v15 = vpop.permute.xlu2 %153 }
 0x2f3   :  { %v159_v20 = vsel %vm157_vm4, %v154_v15, 0.0 }
 0x302   :  { %v152_v18 = vpop.permute.xlu1 %151 }
 0x303   :  { %v158_v22 = vsel %vm157_vm4, %v152_v18, 0.0 }
 0x304   :  { %v447_v23 = vpop.permute.xlu0 %446  ;;  %v160_v24 = vadd.f32 %v159_v20, %v158_v22 }
 0x305   :  { %v451_v28 = vadd.f32 %v447_v23, %v721_v8 }
 0x306   :  { %161 = vadd.xlane.f32.xlu2 %v160_v24 }
 0x307   :  { %v453_v30 = vmul.f32 -0.5, %v451_v28 }
 0x309   :  { %458 = vrot.lane.b32.xlu1 %v453_v30, %s592_s19 }
 0x313   :  { %360 = vadd.xlane.f32.xlu0 %v359_v57 }
 0x333   :  { %415 = vadd.xlane.f32.xlu1 %v731_v37 }
 0x35b   :  { %v457_v8 = vpop.permute.xlu0 %456 }
 0x35c   :  { %v462_v40 = vsel %vm172_vm3, %v457_v8, 0.0 }
 0x379   :  { %v162_v38 = vpop.xlane.xlu2 %161 }
 0x37a   :  { %v163_v51 = vrot.slane %v162_v38, 4 }
 0x37b   :  { %v459_v39 = vpop.permute.xlu1 %458 }
 0x37c   :  { %v164_v41 = vadd.f32 %v163_v51, %v162_v38  ;;  %v463_v42 = vsel %vm172_vm3, %v459_v39, 0.0 }
 0x37d   :  { %v464_v43 = vadd.f32 %v463_v42, %v462_v40 }
 0x37e   :  { %v165_v44 = vrot.slane %v164_v41, 2 }
 0x37f   :  { %465 = vadd.xlane.f32.xlu2 %v464_v43 }
 0x380   :  { %v166_v45 = vadd.f32 %v165_v44, %v164_v41 }
 0x382   :  { %v167_v46 = vrot.slane %v166_v45, 1 }
 0x384   :  { %v168_v47 = vadd.f32 %v167_v46, %v166_v45 }
 0x386   :  { %v361_v48 = vpop.xlane.xlu0 %360  ;;  %526 = vpush %v168_v47 }
 0x387   :  { %v362_v49 = vrot.slane %v361_v48, 4 }
 0x389   :  { %v363_v50 = vadd.f32 %v362_v49, %v361_v48 }
 0x38b   :  { %v364_v37 = vrot.slane %v363_v50, 2 }
 0x38d   :  { %v365_v52 = vadd.f32 %v364_v37, %v363_v50 }
 0x38f   :  { %v366_v3 = vrot.slane %v365_v52, 1 }
 0x391   :  { %v367_v54 = vadd.f32 %v366_v3, %v365_v52 }
 0x393   :  { %528 = vpush %v367_v54 }
 0x3a6   :  { %v416_v55 = vpop.xlane.xlu1 %415 }
 0x3a7   :  { %v417_v56 = vrot.slane %v416_v55, 4 }
 0x3a9   :  { %v418_v58 = vadd.f32 %v417_v56, %v416_v55 }
 0x3ab   :  { %v419_v21 = vrot.slane %v418_v58, 2 }
 0x3ad   :  { %v420_v59 = vadd.f32 %v419_v21, %v418_v58 }
 0x3af   :  { %v421_v60 = vrot.slane %v420_v59, 1 }
 0x3b1   :  { %v422_v4 = vadd.f32 %v421_v60, %v420_v59 }
 0x3b3   :  { %530 = vpush %v422_v4 }
 0x3b7   :  { %s527_s1 = spop %526 }
 0x3b8   :  { %v475_v6 = vstv %s527_s1 }
 0x3b9   :  { %v476_v10 = vsel %vm474_vm11, %v475_v6, 0.0 }
 0x3c4   :  { %s529_s19 = spop %528 }
 0x3c5   :  { %v478_v5 = vstv %s529_s19 }
 0x3c6   :  { %v479_v9 = vsel %vm477_vm10, %v478_v5, 0.0 }
 0x3c7   :  { %v480_v12 = vadd.f32 %v479_v9, %v476_v10 }
 0x3e4   :  { %s531_s27 = spop %530 }
 0x3e5   :  { %v482_v7 = vstv %s531_s27 }
 0x3e6   :  { %v483_v11 = vsel %vm481_vm12, %v482_v7, 0.0 }
 0x3e7   :  { %v484_v13 = vadd.f32 %v483_v11, %v480_v12 }
 0x3f2   :  { %v466_v61 = vpop.xlane.xlu2 %465 }
 0x3f3   :  { %v467_v62 = vrot.slane %v466_v61, 4 }
 0x3f5   :  { %v468_v63 = vadd.f32 %v467_v62, %v466_v61 }
 0x3f7   :  { %v469_v27 = vrot.slane %v468_v63, 2 }
 0x3f9   :  { %v470_v0 = vadd.f32 %v469_v27, %v468_v63 }
 0x3fb   :  { %v471_v1 = vrot.slane %v470_v0, 1 }
 0x3fd   :  { %v472_v2 = vadd.f32 %v471_v1, %v470_v0 }
 0x3ff   :  { %532 = vpush %v472_v2 }
 0x430   :  { %s533_s30 = spop %532 }
 0x431   :  { %v486_v14 = vstv %s533_s30 }
 0x432   :  { %v487_v15 = vsel %vm485_vm13, %v486_v14, 0.0 }
 0x433   :  { %v488_v16 = vadd.f32 %v487_v15, %v484_v13 }
 0x435   :  { %490 = vst.msk [vmem:[#allocation2] sm:$0x1] %vm489_vm14, %v488_v16 }
 0x436   :  { %501 = dma.vmem_to_hbm [thread:$0]  %s497_s29, 16, %s499_s5, [#allocation3]  }
 0x437   :  { %590 = dma.done.wait [#allocation3], 16  }
 0x438   :  { %591 = vsyncadd [#allocation3], 4294967280 }
 0x439   :  { %506 = vsyncpa [#allocation3], 1 }

</bundles_post_ra>
